<compile_context>
chip_gen: v6e
topology: v6e:2x2x1
jax: 0.10.0
libtpu: 0.0.40
codegen_flags: <defaults>
</compile_context>

<pallas_src>
from functools import partial

import numpy as np
import jax
import jax.numpy as jnp
from jax.experimental import pallas as pl
from jax.experimental.pallas import tpu as pltpu

_LOG_2PI = float(np.log(2.0 * np.pi))
_LOG_2_OVER_PI = float(np.log(2.0 / np.pi))

_LANES = 128
_SUBLANES = 8
_MAX_TILE_ROWS = 2048      # 2048 * 128 * 4 B = 1 MiB per input tile
_NUM_SPLITS = 2            # "parallel" outer grid axis (both TCs on v7x;
                           # harmless sequential 2-step loop on v5e/v6e)


def _round_up(x, m):
    return -(-x // m) * m


@partial(jax.jit, static_argnames=("max_tile_rows",))
def _log_joint(xs, ys, theta_0, theta_1, theta_2,
               reg_prior_mu, reg_prior_sd, noise_prior_scale,
               *, max_tile_rows=_MAX_TILE_ROWS):
    xs = jnp.asarray(xs, jnp.float32).reshape(-1)
    ys = jnp.asarray(ys, jnp.float32).reshape(-1)
    n = xs.shape[0]

    # ---- static tiling decisions (Python ints; depend only on shapes) ------
    rows = _round_up(max(1, pl.cdiv(n, _LANES)), _SUBLANES)
    tile_rows = min(max_tile_rows, rows)                  # multiple of 8
    n_tiles = _round_up(pl.cdiv(rows, tile_rows), _NUM_SPLITS)
    tiles_per_split = n_tiles // _NUM_SPLITS
    rows_p = n_tiles * tile_rows
    padded = rows_p * _LANES
    tile_elems = tile_rows * _LANES
    needs_mask = padded != n

    # Minimal tail padding to the tile grid only; the ragged tail is masked
    # in-kernel (iota vs n), so no full-size mask stream is read from HBM.
    # TODO(synk): a fully copy-free path would take xs/ys as raw HBM refs
    # (memory_space=pl.ANY) and DMA the ragged tail manually.
    if needs_mask:
        pad = padded - n
        xs = jnp.pad(xs, (0, pad))
        ys = jnp.pad(ys, (0, pad))
    xs2 = xs.reshape(rows_p, _LANES)
    ys2 = ys.reshape(rows_p, _LANES)

    params = jnp.stack([jnp.asarray(v, jnp.float32)
                        for v in (theta_0, theta_1, theta_2)])   # f32[3], SMEM
    n_arr = jnp.array([n], jnp.int32)                            # i32[1], SMEM

    def kernel(params_ref, n_ref, xs_ref, ys_ref, out_ref):
        c = pl.program_id(0)          # split (parallel on v7x)
        i = pl.program_id(1)          # tile index within split (reduction)

        @pl.when(i == 0)
        def _init():
            out_ref[...] = jnp.zeros_like(out_ref)

        th0 = params_ref[0]
        th1 = params_ref[1]
        inv_sigma = 1.0 / params_ref[2]

        z = (ys_ref[...] - (th0 + th1 * xs_ref[...])) * inv_sigma
        zsq = z * z

        if not needs_mask:
            out_ref[...] += zsq
        else:
            n_valid = n_ref[0]
            tile_start = (c * pl.num_programs(1) + i) * tile_elems
            full = tile_start + tile_elems <= n_valid

            @pl.when(full)                       # common case: no mask work
            def _full():
                out_ref[...] += zsq

            @pl.when(jnp.logical_not(full))      # ragged tail / padded tiles
            def _tail():
                row = jax.lax.broadcasted_iota(jnp.int32, (tile_rows, _LANES), 0)
                lane = jax.lax.broadcasted_iota(jnp.int32, (tile_rows, _LANES), 1)
                idx = tile_start + row * _LANES + lane
                out_ref[...] += jnp.where(idx < n_valid, zsq, 0.0)

    partials = pl.pallas_call(
        kernel,
        out_shape=jax.ShapeDtypeStruct((_NUM_SPLITS * tile_rows, _LANES),
                                       jnp.float32),
        grid=(_NUM_SPLITS, tiles_per_split),
        in_specs=[
            pl.BlockSpec(memory_space=pltpu.MemorySpace.SMEM),   # params f32[3]
            pl.BlockSpec(memory_space=pltpu.MemorySpace.SMEM),   # n      i32[1]
            pl.BlockSpec((tile_rows, _LANES),
                         lambda c, i: (c * tiles_per_split + i, 0)),
            pl.BlockSpec((tile_rows, _LANES),
                         lambda c, i: (c * tiles_per_split + i, 0)),
        ],
        out_specs=pl.BlockSpec((tile_rows, _LANES), lambda c, i: (c, 0)),
        compiler_params=pltpu.CompilerParams(
            dimension_semantics=("parallel", "arbitrary"),
            vmem_limit_bytes=32 * 1024 * 1024),
    )(params, n_arr, xs2, ys2)

    # ---- O(1) scalar epilogue (hoisted constant + prior contributions) -----
    quad = jnp.sum(partials)                      # sum of z^2 over valid lanes
    th0, th1, th2 = params[0], params[1], params[2]
    mu = jnp.asarray(reg_prior_mu, jnp.float32)
    sd = jnp.asarray(reg_prior_sd, jnp.float32)
    hs = jnp.asarray(noise_prior_scale, jnp.float32)

    data_lp = -0.5 * quad + jnp.float32(n) * (-jnp.log(th2) - 0.5 * _LOG_2PI)

    z0 = (th0 - mu) / sd
    c0 = -0.5 * z0 * z0 - jnp.log(sd) - 0.5 * _LOG_2PI
    z1 = (th1 - mu) / sd
    c1 = -0.5 * z1 * z1 - jnp.log(sd) - 0.5 * _LOG_2PI
    z2 = th2 / hs
    c2 = 0.5 * _LOG_2_OVER_PI - jnp.log(hs) - 0.5 * z2 * z2

    return data_lp + c0 + c1 + c2


class ModelPallas:
    """Pallas port of the PyTorch `Model`.

    # TODO(synk): the Normal/HalfNormal parameter-module internals and
    # `constraint_contrib.add_tensor` are not shown in the reference snippet;
    # they are modeled as standard log-prior densities summed with the data
    # log-likelihood (scalar log-joint), matching the in-file reference.
    """

    def __init__(self, reg_prior_mu, reg_prior_sd, noise_prior_scale):
        self.reg_prior_mu = float(reg_prior_mu)
        self.reg_prior_sd = float(reg_prior_sd)
        self.noise_prior_scale = float(noise_prior_scale)
        # Deterministic parameter init (prior mean / half-normal mean).
        self.theta_0 = float(reg_prior_mu)
        self.theta_1 = float(reg_prior_mu)
        self.theta_2 = float(noise_prior_scale) * float(np.sqrt(2.0 / np.pi))

    def forward(self, xs, ys):
        return _log_joint(
            xs, ys,
            self.theta_0, self.theta_1, self.theta_2,
            self.reg_prior_mu, self.reg_prior_sd, self.noise_prior_scale,
        )

    __call__ = forward


def _reference_log_joint(model, xs, ys):
    """Pure-JAX reference for correctness checking."""
    th0, th1, th2 = model.theta_0, model.theta_1, model.theta_2
    mu, sd, hs = model.reg_prior_mu, model.reg_prior_sd, model.noise_prior_scale
    y_mu = th0 + th1 * xs
    z = (ys - y_mu) / th2
    data_lp = jnp.sum(-0.5 * z * z - jnp.log(jnp.float32(th2)) - 0.5 * _LOG_2PI)

    def nlp(v):
        zz = (v - mu) / sd
        return -0.5 * zz * zz - jnp.log(jnp.float32(sd)) - 0.5 * _LOG_2PI

    z2 = th2 / hs
    hnlp = 0.5 * _LOG_2_OVER_PI - jnp.log(jnp.float32(hs)) - 0.5 * z2 * z2
    return data_lp + nlp(th0) + nlp(th1) + hnlp


if __name__ == "__main__":
    kx, kn, k2x, k2n = jax.random.split(jax.random.PRNGKey(0), 4)

    model = ModelPallas(reg_prior_mu=0.0, reg_prior_sd=2.0, noise_prior_scale=1.0)

    # Small demo: N deliberately not a multiple of 128 (exercises the
    # in-kernel ragged-tail mask path).
    N = 1000
    xs = jax.random.normal(kx, (N,), dtype=jnp.float32) * 2.0
    ys = 0.5 + 1.7 * xs + 0.3 * jax.random.normal(kn, (N,), dtype=jnp.float32)

    out = jax.block_until_ready(model(xs, ys))
    ref = jax.block_until_ready(_reference_log_joint(model, xs, ys))
    assert jnp.allclose(out, ref, rtol=1e-4, atol=1e-2), (out, ref)

    # Second check: force tiny tiles so the multi-tile accumulation,
    # fully-padded-tile and both-split paths are all exercised.
    N2 = 20000
    xs2 = jax.random.normal(k2x, (N2,), dtype=jnp.float32)
    ys2 = 0.5 + 1.7 * xs2 + 0.3 * jax.random.normal(k2n, (N2,), dtype=jnp.float32)
    out2 = jax.block_until_ready(_log_joint(
        xs2, ys2, model.theta_0, model.theta_1, model.theta_2,
        model.reg_prior_mu, model.reg_prior_sd, model.noise_prior_scale,
        max_tile_rows=64))
    ref2 = jax.block_until_ready(_reference_log_joint(model, xs2, ys2))
    assert jnp.allclose(out2, ref2, rtol=1e-4, atol=1e-2), (out2, ref2)

    print("KERNEL_OK")
</pallas_src>

<mosaic_0001>
module attributes {stable_mosaic.version = 11 : i64} {
  func.func @kernel(%arg0: i32, %arg1: i32, %arg2: memref<3xf32, #tpu.memory_space<smem>>, %arg3: memref<1xi32, #tpu.memory_space<smem>>, %arg4: memref<8x128xf32, #tpu.memory_space<vmem>>, %arg5: memref<8x128xf32, #tpu.memory_space<vmem>>, %arg6: memref<8x128xf32, #tpu.memory_space<vmem>>) attributes {dimension_semantics = [#tpu.dimension_semantics<parallel>, #tpu.dimension_semantics<arbitrary>], iteration_bounds = array<i64: 2, 1>, scalar_prefetch = 0 : i64, scratch_operands = 0 : i64, tpu.core_type = #tpu.core_type<tc>, window_params = [{transform_indices = @transform_0, window_bounds = array<i64: 3>}, {transform_indices = @transform_1, window_bounds = array<i64: 1>}, {transform_indices = @transform_2, window_bounds = array<i64: 8, 128>}, {transform_indices = @transform_3, window_bounds = array<i64: 8, 128>}, {transform_indices = @transform_4, window_bounds = array<i64: 8, 128>}]} {
    %c0_i32 = arith.constant 0 : i32
    %0 = arith.cmpi eq, %arg1, %c0_i32 : i32
    %1 = arith.extui %0 : i1 to i32
    %c0_i32_0 = arith.constant 0 : i32
    %2 = arith.cmpi ne, %1, %c0_i32_0 : i32
    scf.if %2 {
      %cst_9 = arith.constant 0.000000e+00 : f32
      %28 = vector.broadcast %cst_9 : f32 to vector<8x128xf32>
      %c0_10 = arith.constant 0 : index
      %c0_11 = arith.constant 0 : index
      %29 = vector.load %arg6[%c0_10, %c0_11] : memref<8x128xf32, #tpu.memory_space<vmem>>, vector<8x128xf32>
      tpu.vector_store %arg6[%c0_10, %c0_11], %28 {strides = array<i32>} : memref<8x128xf32, #tpu.memory_space<vmem>>, vector<8x128xf32>,
    } else {
    }
    %c0 = arith.constant 0 : index
    %3 = memref.load %arg2[%c0] : memref<3xf32, #tpu.memory_space<smem>>
    %c1 = arith.constant 1 : index
    %4 = memref.load %arg2[%c1] : memref<3xf32, #tpu.memory_space<smem>>
    %c2 = arith.constant 2 : index
    %5 = memref.load %arg2[%c2] : memref<3xf32, #tpu.memory_space<smem>>
    %cst = arith.constant 1.000000e+00 : f32
    %6 = arith.divf %cst, %5 : f32
    %c0_1 = arith.constant 0 : index
    %c0_2 = arith.constant 0 : index
    %7 = vector.load %arg5[%c0_1, %c0_2] : memref<8x128xf32, #tpu.memory_space<vmem>>, vector<8x128xf32>
    %c0_3 = arith.constant 0 : index
    %c0_4 = arith.constant 0 : index
    %8 = vector.load %arg4[%c0_3, %c0_4] : memref<8x128xf32, #tpu.memory_space<vmem>>, vector<8x128xf32>
    %9 = vector.broadcast %4 : f32 to vector<8x128xf32>
    %10 = arith.mulf %9, %8 : vector<8x128xf32>
    %11 = vector.broadcast %3 : f32 to vector<8x128xf32>
    %12 = arith.addf %11, %10 : vector<8x128xf32>
    %13 = arith.subf %7, %12 : vector<8x128xf32>
    %14 = vector.broadcast %6 : f32 to vector<8x128xf32>
    %15 = arith.mulf %13, %14 : vector<8x128xf32>
    %16 = arith.mulf %15, %15 : vector<8x128xf32>
    %c0_5 = arith.constant 0 : index
    %17 = memref.load %arg3[%c0_5] : memref<1xi32, #tpu.memory_space<smem>>
    %c1_i32 = arith.constant 1 : i32
    %18 = arith.muli %arg0, %c1_i32 : i32
    %19 = arith.addi %18, %arg1 : i32
    %c1024_i32 = arith.constant 1024 : i32
    %20 = arith.muli %19, %c1024_i32 : i32
    %c1024_i32_6 = arith.constant 1024 : i32
    %21 = arith.addi %20, %c1024_i32_6 : i32
    %22 = arith.cmpi sle, %21, %17 : i32
    %23 = arith.extui %22 : i1 to i32
    %c0_i32_7 = arith.constant 0 : i32
    %24 = arith.cmpi ne, %23, %c0_i32_7 : i32
    scf.if %24 {
      %c0_9 = arith.constant 0 : index
      %c0_10 = arith.constant 0 : index
      %28 = vector.load %arg6[%c0_9, %c0_10] : memref<8x128xf32, #tpu.memory_space<vmem>>, vector<8x128xf32>
      %29 = arith.addf %28, %16 : vector<8x128xf32>
      %c0_11 = arith.constant 0 : index
      %c0_12 = arith.constant 0 : index
      %30 = vector.load %arg6[%c0_11, %c0_12] : memref<8x128xf32, #tpu.memory_space<vmem>>, vector<8x128xf32>
      tpu.vector_store %arg6[%c0_11, %c0_12], %29 {strides = array<i32>} : memref<8x128xf32, #tpu.memory_space<vmem>>, vector<8x128xf32>,
    } else {
    }
    %true = arith.constant true
    %25 = arith.xori %22, %true : i1
    %26 = arith.extui %25 : i1 to i32
    %c0_i32_8 = arith.constant 0 : i32
    %27 = arith.cmpi ne, %26, %c0_i32_8 : i32
    scf.if %27 {
      %28 = tpu.iota {dimensions = array<i32: 0>} : vector<8x128xi32>
      %29 = tpu.iota {dimensions = array<i32: 1>} : vector<8x128xi32>
      %c128_i32 = arith.constant 128 : i32
      %30 = vector.broadcast %c128_i32 : i32 to vector<8x128xi32>
      %31 = arith.muli %28, %30 : vector<8x128xi32>
      %32 = vector.broadcast %20 : i32 to vector<8x128xi32>
      %33 = arith.addi %32, %31 : vector<8x128xi32>
      %34 = arith.addi %33, %29 : vector<8x128xi32>
      %c0_9 = arith.constant 0 : index
      %c0_10 = arith.constant 0 : index
      %35 = vector.load %arg6[%c0_9, %c0_10] : memref<8x128xf32, #tpu.memory_space<vmem>>, vector<8x128xf32>
      %36 = vector.broadcast %17 : i32 to vector<8x128xi32>
      %37 = arith.cmpi slt, %34, %36 : vector<8x128xi32>
      %cst_11 = arith.constant 0.000000e+00 : f32
      %38 = vector.broadcast %cst_11 : f32 to vector<8x128xf32>
      %39 = arith.select %37, %16, %38 : vector<8x128xi1>, vector<8x128xf32>
      %40 = arith.addf %35, %39 : vector<8x128xf32>
      %c0_12 = arith.constant 0 : index
      %c0_13 = arith.constant 0 : index
      %41 = vector.load %arg6[%c0_12, %c0_13] : memref<8x128xf32, #tpu.memory_space<vmem>>, vector<8x128xf32>
      tpu.vector_store %arg6[%c0_12, %c0_13], %40 {strides = array<i32>} : memref<8x128xf32, #tpu.memory_space<vmem>>, vector<8x128xf32>,
    } else {
    }
    return
  }
  func.func @transform_0(%arg0: i32, %arg1: i32) -> i32 {
    %c0_i32 = arith.constant 0 : i32
    %c0_i32_0 = arith.constant 0 : i32
    return %c0_i32 : i32
  }
  func.func @transform_1(%arg0: i32, %arg1: i32) -> i32 {
    %c0_i32 = arith.constant 0 : i32
    %c0_i32_0 = arith.constant 0 : i32
    return %c0_i32 : i32
  }
  func.func @transform_2(%arg0: i32, %arg1: i32) -> (i32, i32) {
    %c1_i32 = arith.constant 1 : i32
    %0 = arith.muli %arg0, %c1_i32 : i32
    %1 = arith.addi %0, %arg1 : i32
    %c0_i32 = arith.constant 0 : i32
    %c0_i32_0 = arith.constant 0 : i32
    return %1, %c0_i32 : i32, i32
  }
  func.func @transform_3(%arg0: i32, %arg1: i32) -> (i32, i32) {
    %c1_i32 = arith.constant 1 : i32
    %0 = arith.muli %arg0, %c1_i32 : i32
    %1 = arith.addi %0, %arg1 : i32
    %c0_i32 = arith.constant 0 : i32
    %c0_i32_0 = arith.constant 0 : i32
    return %1, %c0_i32 : i32, i32
  }
  func.func @transform_4(%arg0: i32, %arg1: i32) -> (i32, i32) {
    %c0_i32 = arith.constant 0 : i32
    %c0_i32_0 = arith.constant 0 : i32
    return %arg0, %c0_i32 : i32, i32
  }
}

</mosaic_0001>

<bundles_post_ra>
// kernel: _log_joint.1
= control target key start
LH: loop header
LB: loop body
LE: loop exit
PB: predicated region body
PF: predicated region fallthrough
CT: control target
= control target key end

     0   :  { %s600_s0 = inlined_call_operand.vmem [shape: f32[3], index: 0, kind: input, shape index: {}]   ;;  %s601_s1 = inlined_call_operand.<no memory space> [shape: s32[1], index: 1, kind: input, shape index: {}]   ;;  %s602_s2 = inlined_call_operand.vmem [shape: f32[16,128], index: 2, kind: input, shape index: {}]   ;;  %s603_s3 = inlined_call_operand.vmem [shape: f32[16,128], index: 3, kind: input, shape index: {}]   ;;  %s604_s4 = inlined_call_operand.vmem [shape: f32[16,128], index: 4, kind: output, shape index: {}]  }
   0x1   :  { %9 = sst [smem:[#allocation2]] %s601_s1 }
   0x2   :  { %10 = vsyncpa [#allocation4], 0  ;;  %s517_s17 = smov 0   ;;  %s519_s18 = smov 0  }
   0x3   :  { %s521_s19 = smov 0  }
   0x4 LB: > { %s387_s1 = sadd.s32 4294967295, %s485_s19   ;;  %s28_s20 = sadd.s32 1, %s481_s18  ;;  %s485_s19 = sphi %s521_s19, %s16_s19   ;;  %s481_s18 = sphi %s519_s18, %s608_s18   ;;  %s477_s17 = sphi %s517_s17, %s607_s17  }
   0x5   : > { %p30_p0 = scmp.ge.s32.totalorder %s28_s20, 2  ;;  %p389_p1 = scmp.ge.s32.totalorder %s485_s19, 1 }
   0x6   : > { %p157_p2 = scmp.lt.s32.totalorder %s485_s19, 3  ;;  %p542_p4 = scmp.eq.s32.totalorder %s387_s1, 0 }
   0x7   : > { %s610_s20 = smov (%p30_p0, %s28_s20), 0  ;;  %s170_s25 = sshll.u32 %s600_s0, 4  ;;  %s171_s25 = int_to_ptr.vmem [resolvable:$true] %s170_s25 }
   0x8   : > { %p538_p3 = pnand %p389_p1, %p157_p2  ;;  %s444_s26 = scalar_lea.vmem %s171_s25, 16 }
   0x9   : > { %p445_p7 = scmp.ne.s32.totalorder %s171_s25, %s444_s26  ;;  %p452_p11 = scmp.lt.s32.totalorder %s171_s25, %s171_s25 }
   0xa   : > { %p410_p5 = pneg %p538_p3  ;;  %p453_p12 = scmp.lt.s32.totalorder %s444_s26, %s444_s26 }
   0xc   : > { %p411_p6 = pnand %p542_p4, %p410_p5  ;;  %p454_p13 = por %p453_p12, %p452_p11 }
   0xe   : > { %p446_p8 = pneg %p411_p6 }
  0x10   : > { %p447_p9 = pnand %p446_p8, %p445_p7 }
  0x12   : > { %p448_p10 = pneg %p447_p9 }
  0x14   : > { %p455_p0 = pnand %p454_p13, %p448_p10 }
  0x16   : > { %458 = shalt.err (!%p455_p0)
}
  0x17   : > { %s487_s27 = smov [#allocation3]   ;;  %204 = sbr.rel (%p538_p3) target bundleno = 132 (0x84), region = 36 }
  0x18   : > { %413 = dma.vmem_to_smem (!%p411_p6), %s171_s25, 16, %s487_s27, [#allocation4]  }
  0x1c   : > { %472 = dma.done.wait (%p542_p4), [#allocation4], 16  }
  0x1d   : > { %474 = vsyncadd (%p542_p4), [#allocation4], 4294967280 }
  0x1e   : > { %210 = sfence }
  0x1f   : > { %s398_s28 = sld [smem:[#allocation3 + $0x2]]  ;;  %p236_p1 = scmp.lt.s32.totalorder %s477_s17, 1  ;;  %v488_v1 = vmov 0.0  }
  0x20   : > { %s399_s29 = sshll.u32 %s477_s17, 10  ;;  %s566_s6 = sld [smem:[#allocation2]] }
  0x21   : > { %s237_s30 = scalar_select %p236_p1, %s477_s17, 1 }
  0x22   : > { %s564_s5 = sadd.s32 1024, %s399_s29  ;;  %s397_s11 = sld [smem:[#allocation3 + $0x1]] }
  0x23   : > { %s394_s7 = sshll.u32 %s237_s30, 3  ;;  %s256_s12 = sld [smem:[#allocation3]] }
  0x24   : > { %s571_s10 = scalar_lea.vmem %s604_s4, %s394_s7  ;;  %s239_s15 = scalar_lea.vmem %s602_s2, %s394_s7 }
  0x25   : > { %v259_v0 = vstv %s398_s28  ;;  %255 = vst [vmem:[%s571_s10] sm:$0xff] %v488_v1  ;;  %v263_v3 = vld [vmem:[%s239_s15] sm:$0xff]  ;;  %s245_s21 = scalar_lea.vmem %s603_s3, %s394_s7 }
  0x26   : > { %442 = vrcp.f32 %v259_v0  ;;  %v262_v8 = vld [vmem:[%s245_s21] sm:$0xff]  ;;  %p400_p2 = scmp.gt.s32.totalorder %s564_s5, %s566_s6 }
  0x28   : > { %v264_v4 = vstv %s397_s11 }
  0x29   : > { %v265_v5 = vmul.f32 %v264_v4, %v263_v3  ;;  %v266_v6 = vstv %s256_s12 }
  0x2b   : > { %v267_v7 = vadd.f32 %v266_v6, %v265_v5 }
  0x2d   : > { %v268_v9 = vsub.f32 %v262_v8, %v267_v7 }
  0x33   : > { %v443_v2 = vpop.eup %442 }
  0x34   : > { %404 = vpush %v443_v2 }
  0x65   : > { %s405_s22 = spop %404  ;;  %279 = sbr.rel (%p400_p2) target bundleno = 110 (0x6e), region = 48 }
  0x66   : > { %v269_v10 = vstv %s405_s22 }
  0x67   : > { %v270_v11 = vmul.f32 %v269_v10, %v268_v9 }
  0x69   : > { %v271_v12 = vmul.f32 %v270_v11, %v270_v11 }
  0x6a   : > { %v280_v13 = vld [vmem:[%s571_s10] sm:$0xff] }
  0x6b   : > { %v281_v14 = vadd.f32 %v280_v13, %v271_v12 }
  0x6d   : > { %282 = vst [vmem:[%s571_s10] sm:$0xff] %v281_v14 }
  0x6e PF: > { %p401_p3 = scmp.le.s32.totalorder %s564_s5, %s566_s6 }
  0x70   : > { %286 = sbr.rel (%p401_p3) target bundleno = 132 (0x84), region = 52 }
  0x75   : > { %v287_v15 = vlaneseq  ;;  %v292_v17 = vstv %s399_s29  ;;  %v296_v21 = vstv %s566_s6  ;;  %v295_v23 = vld [vmem:[%s571_s10] sm:$0xff] }
  0x77   : > { %v288_v16 = vshrl.u32 %v287_v15, 7  ;;  %v290_v18 = vand.u32 127, %v287_v15 }
  0x79   : > { %v291_v19 = vmul.u32 128, %v288_v16 }
  0x7b   : > { %v293_v20 = vadd.s32 %v292_v17, %v291_v19 }
  0x7d   : > { %v294_v22 = vadd.s32 %v293_v20, %v290_v18 }
  0x7f   : > { %vm297_vm0 = vcmp.lt.s32.totalorder %v294_v22, %v296_v21 }
  0x80   : > { %v298_v24 = vsel %vm297_vm0, %v271_v12, 0.0 }
  0x81   : > { %v299_v25 = vadd.f32 %v298_v24, %v295_v23 }
  0x83   : > { %300 = vst [vmem:[%s571_s10] sm:$0xff] %v299_v25 }
  0x84 PF: > { %s16_s19 = sadd.s32 1, %s485_s19   ;;  %s607_s17 = smov %s481_s18 }
  0x85   : > { %p13_p4 = scmp.ge.s32.totalorder %s16_s19, 4   ;;  %s608_s18 = smov %s610_s20 }
  0x87   :  { %15 = sbr.rel (!%p13_p4) target bundleno = 4 (0x4), region = 86 }
  0x8c   :  { %320 = vsyncpa [#allocation4], 1 }
  0x8d   :  { %322 = vsyncpa [#allocation4 + $0x1], 1 }

</bundles_post_ra>
